<compile_context>
chip_gen: v6e
topology: v6e:2x2x1
jax: 0.10.0
libtpu: 0.0.40
codegen_flags: <defaults>
</compile_context>

<pallas_src>
import jax
import jax.numpy as jnp
from jax.experimental import pallas as pl
from jax.experimental.pallas import tpu as pltpu

IN_DIM = 3 * 28 * 28   # 2352, matches torch's x.view(B, -1) on NCHW input
HID = 128              # hidden width padded from 100 (zero-filled)
FEAT = 128             # feature width padded from 16 (zero-filled)
OUT = 128              # lane-dense padded num_classes


def mlp_disentangle_kernel(x_ref, w1_ref, w2_ref, w3_ref, w4_ref, b_ref, out_ref):
    # x arrives in its native dtype (f32 or uint8); cast on the VPU (mem-bound
    # kernel -> VPU slack is free).  1/255 is already folded into w1.
    x = x_ref[...].astype(jnp.bfloat16)                               # (TB, 2352)
    h = jnp.dot(x, w1_ref[...], preferred_element_type=jnp.float32) + b_ref[0:1, :]
    h = jnp.maximum(h, 0.0).astype(jnp.bfloat16)
    h = jnp.dot(h, w2_ref[...], preferred_element_type=jnp.float32) + b_ref[1:2, :]
    h = jnp.maximum(h, 0.0).astype(jnp.bfloat16)
    h = jnp.dot(h, w3_ref[...], preferred_element_type=jnp.float32) + b_ref[2:3, :]
    h = jnp.maximum(h, 0.0).astype(jnp.bfloat16)
    out = jnp.dot(h, w4_ref[...], preferred_element_type=jnp.float32) + b_ref[3:4, :]
    out_ref[...] = out.astype(out_ref.dtype)                          # bf16 writeback


def _pad2d(a, rows, cols):
    out = jnp.zeros((rows, cols), jnp.float32)
    return out.at[:a.shape[0], :a.shape[1]].set(a.astype(jnp.float32))


def prep_params(params):
    """One-time prep: fold 1/255 into w1, zero-pad to 128-wide lanes, cast
    weights to bf16; pack the four biases into one (4, 128) f32 array.
    Zero-padded hidden lanes + zero bias stay exactly zero after ReLU, so the
    padding does not change the math."""
    (w1, b1), (w2, b2), (w3, b3), (w4, b4) = params
    w1p = _pad2d(w1 * (1.0 / 255.0), IN_DIM, HID).astype(jnp.bfloat16)
    w2p = _pad2d(w2, HID, HID).astype(jnp.bfloat16)
    w3p = _pad2d(w3, HID, FEAT).astype(jnp.bfloat16)
    w4p = _pad2d(w4, FEAT, OUT).astype(jnp.bfloat16)
    bias = jnp.zeros((4, OUT), jnp.float32)
    bias = bias.at[0, :b1.size].set(b1.reshape(-1).astype(jnp.float32))
    bias = bias.at[1, :b2.size].set(b2.reshape(-1).astype(jnp.float32))
    bias = bias.at[2, :b3.size].set(b3.reshape(-1).astype(jnp.float32))
    bias = bias.at[3, :b4.size].set(b4.reshape(-1).astype(jnp.float32))
    return (w1p, w2p, w3p, w4p, bias)


def mlp_disentangle_forward(x_nchw, prepped, num_classes, block_b=1024):
    """Forward pass; returns final_x (logits), matching forward(x) default path.

    x_nchw may be f32 or integral pixel data (uint8); it is streamed from HBM
    in its native dtype and upcast to bf16 inside the kernel.
    """
    w1p, w2p, w3p, w4p, bias = prepped
    B = x_nchw.shape[0]
    x_flat = x_nchw.reshape(B, -1)                  # view-like reshape, no cast
    assert x_flat.shape[1] == IN_DIM, "input must flatten to 3*28*28"

    # Sublane alignment depends on the input element width (f32:8, bf16:16, u8:32).
    itemsize = jnp.dtype(x_flat.dtype).itemsize
    align = {4: 8, 2: 16, 1: 32}.get(itemsize, 8)
    if B >= block_b:
        tb = block_b
    else:
        tb = -(-B // align) * align                 # round B up to alignment
    grid = (pl.cdiv(B, tb),)                        # ragged last tile is fine

    const = lambda i: (0, 0)                        # weights/biases resident across grid
    in_specs = [
        pl.BlockSpec((tb, IN_DIM), lambda i: (i, 0)),   # x streamed over batch
        pl.BlockSpec((IN_DIM, HID), const),
        pl.BlockSpec((HID, HID), const),
        pl.BlockSpec((HID, FEAT), const),
        pl.BlockSpec((FEAT, OUT), const),
        pl.BlockSpec((4, OUT), const),
    ]
    out_spec = pl.BlockSpec((tb, OUT), lambda i: (i, 0))

    flops = 2 * B * (IN_DIM * HID + HID * HID + HID * FEAT + FEAT * OUT)
    bytes_accessed = (
        int(x_flat.size) * itemsize
        + sum(int(a.size) * a.dtype.itemsize for a in prepped)
        + B * OUT * 2                               # bf16 output
    )

    out = pl.pallas_call(
        mlp_disentangle_kernel,
        out_shape=jax.ShapeDtypeStruct((B, OUT), jnp.bfloat16),
        grid=grid,
        in_specs=in_specs,
        out_specs=out_spec,
        compiler_params=pltpu.CompilerParams(
            dimension_semantics=("parallel",),
            vmem_limit_bytes=48 * 1024 * 1024,      # TB=1024 f32-x tile needs ~21 MiB
        ),
        cost_estimate=pl.CostEstimate(
            flops=flops, transcendentals=0, bytes_accessed=bytes_accessed),
    )(x_flat, w1p, w2p, w3p, w4p, bias)

    # Slice off batch ragged-tile rows and lane padding; tiny f32 cast for the
    # PyTorch-like interface.
    return out[:B, :num_classes].astype(jnp.float32)


def init_params(key, num_classes=10, bias=True):
    """Deterministic params. Weights stored as (in, out); biases as (1, out)."""
    dims = [(IN_DIM, 100), (100, 100), (100, 16), (16, num_classes)]
    params = []
    for i, (fan_in, fan_out) in enumerate(dims):
        kw, kb = jax.random.split(jax.random.fold_in(key, i))
        bound = 1.0 / (fan_in ** 0.5)
        w = jax.random.uniform(kw, (fan_in, fan_out), jnp.float32, -bound, bound)
        if bias:
            b = jax.random.uniform(kb, (1, fan_out), jnp.float32, -bound, bound)
        else:
            b = jnp.zeros((1, fan_out), jnp.float32)
        params.append((w, b))
    return params


def reference_forward_f32(x_nchw, params):
    """Plain-JAX f32 reference identical to the PyTorch forward."""
    B = x_nchw.shape[0]
    h = x_nchw.reshape(B, -1).astype(jnp.float32) / 255.0
    (w1, b1), (w2, b2), (w3, b3), (w4, b4) = params
    h = jnp.maximum(h @ w1 + b1, 0.0)
    h = jnp.maximum(h @ w2 + b2, 0.0)
    h = jnp.maximum(h @ w3 + b3, 0.0)
    return h @ w4 + b4


def reference_forward_bf16(x_nchw, prepped, num_classes):
    """Same padded/bf16 math as the kernel, in plain JAX (tight check)."""
    w1p, w2p, w3p, w4p, bias = prepped
    B = x_nchw.shape[0]
    h = x_nchw.reshape(B, -1).astype(jnp.bfloat16)
    h = jnp.maximum(jnp.dot(h, w1p, preferred_element_type=jnp.float32) + bias[0:1, :],
                    0.0).astype(jnp.bfloat16)
    h = jnp.maximum(jnp.dot(h, w2p, preferred_element_type=jnp.float32) + bias[1:2, :],
                    0.0).astype(jnp.bfloat16)
    h = jnp.maximum(jnp.dot(h, w3p, preferred_element_type=jnp.float32) + bias[2:3, :],
                    0.0).astype(jnp.bfloat16)
    logits = (jnp.dot(h, w4p, preferred_element_type=jnp.float32)
              + bias[3:4, :]).astype(jnp.bfloat16)
    return logits[:, :num_classes].astype(jnp.float32)


if __name__ == "__main__":
    key = jax.random.PRNGKey(0)
    kx, kp = jax.random.split(key)

    B, num_classes = 8, 10
    # pixel-like inputs in [0, 255); fed to the kernel in native f32
    # (integral uint8 pixel data is also supported and halves x HBM traffic).
    x = jax.random.uniform(kx, (B, 3, 28, 28), jnp.float32, 0.0, 255.0)
    params = init_params(kp, num_classes=num_classes, bias=True)
    prepped = prep_params(params)

    out = mlp_disentangle_forward(x, prepped, num_classes)
    out = jax.block_until_ready(out)
    assert out.shape == (B, num_classes)

    # Tight check vs. a plain-JAX replica of the same bf16/padded math.
    ref_bf16 = reference_forward_bf16(x, prepped, num_classes)
    assert jnp.allclose(out, ref_bf16, atol=2e-2, rtol=2e-2), "mismatch vs bf16 ref"

    # Loose sanity check vs. the exact f32 PyTorch-equivalent forward
    # (bf16 x/weights over K=2352 costs ~0.4% relative error; acceptable for inference).
    ref_f32 = reference_forward_f32(x, params)
    rel_err = jnp.max(jnp.abs(out - ref_f32)) / (jnp.max(jnp.abs(ref_f32)) + 1e-6)
    assert rel_err < 0.1, f"rel err vs f32 ref too large: {rel_err}"

    print("KERNEL_OK")
</pallas_src>

<mosaic_0001>
module attributes {stable_mosaic.version = 11 : i64} {
  func.func @mlp_disentangle_kernel(%arg0: i32, %arg1: memref<8x2352xf32, #tpu.memory_space<vmem>>, %arg2: memref<2352x128xbf16, #tpu.memory_space<vmem>>, %arg3: memref<128x128xbf16, #tpu.memory_space<vmem>>, %arg4: memref<128x128xbf16, #tpu.memory_space<vmem>>, %arg5: memref<128x128xbf16, #tpu.memory_space<vmem>>, %arg6: memref<4x128xf32, #tpu.memory_space<vmem>>, %arg7: memref<8x128xbf16, #tpu.memory_space<vmem>>) attributes {dimension_semantics = [#tpu.dimension_semantics<parallel>], iteration_bounds = array<i64: 1>, scalar_prefetch = 0 : i64, scratch_operands = 0 : i64, tpu.core_type = #tpu.core_type<tc>, window_params = [{transform_indices = @transform_0, window_bounds = array<i64: 8, 2352>}, {pipeline_mode = #tpu.pipeline_mode<synchronous>, transform_indices = @transform_1, window_bounds = array<i64: 2352, 128>}, {pipeline_mode = #tpu.pipeline_mode<synchronous>, transform_indices = @transform_2, window_bounds = array<i64: 128, 128>}, {pipeline_mode = #tpu.pipeline_mode<synchronous>, transform_indices = @transform_3, window_bounds = array<i64: 128, 128>}, {pipeline_mode = #tpu.pipeline_mode<synchronous>, transform_indices = @transform_4, window_bounds = array<i64: 128, 128>}, {pipeline_mode = #tpu.pipeline_mode<synchronous>, transform_indices = @transform_5, window_bounds = array<i64: 4, 128>}, {transform_indices = @transform_6, window_bounds = array<i64: 8, 128>}]} {
    %c0 = arith.constant 0 : index
    %c0_0 = arith.constant 0 : index
    %0 = vector.load %arg1[%c0, %c0_0] : memref<8x2352xf32, #tpu.memory_space<vmem>>, vector<8x2352xf32>
    %1 = arith.truncf %0 : vector<8x2352xf32> to vector<8x2352xbf16>
    %c0_1 = arith.constant 0 : index
    %c0_2 = arith.constant 0 : index
    %2 = vector.load %arg2[%c0_1, %c0_2] : memref<2352x128xbf16, #tpu.memory_space<vmem>>, vector<2352x128xbf16>
    %cst = arith.constant dense<0.000000e+00> : vector<8x128xf32>
    %3 = tpu.matmul %1, %2, %cst {dimension_numbers = #tpu.dot_dimension_numbers<[1], [0], [0], [1], [0, 0, 1, 1], [], []>} : vector<8x2352xbf16>, vector<2352x128xbf16>, vector<8x128xf32> -> vector<8x128xf32>
    %c0_3 = arith.constant 0 : index
    %c0_4 = arith.constant 0 : index
    %4 = vector.load %arg6[%c0_3, %c0_4] : memref<4x128xf32, #tpu.memory_space<vmem>>, vector<1x128xf32>
    %5 = vector.broadcast %4 : vector<1x128xf32> to vector<8x128xf32>
    %6 = arith.addf %3, %5 : vector<8x128xf32>
    %cst_5 = arith.constant 0.000000e+00 : f32
    %7 = vector.broadcast %cst_5 : f32 to vector<8x128xf32>
    %8 = arith.maximumf %6, %7 : vector<8x128xf32>
    %9 = arith.truncf %8 : vector<8x128xf32> to vector<8x128xbf16>
    %c0_6 = arith.constant 0 : index
    %c0_7 = arith.constant 0 : index
    %10 = vector.load %arg3[%c0_6, %c0_7] : memref<128x128xbf16, #tpu.memory_space<vmem>>, vector<128x128xbf16>
    %cst_8 = arith.constant dense<0.000000e+00> : vector<8x128xf32>
    %11 = tpu.matmul %9, %10, %cst_8 {dimension_numbers = #tpu.dot_dimension_numbers<[1], [0], [0], [1], [0, 0, 1, 1], [], []>} : vector<8x128xbf16>, vector<128x128xbf16>, vector<8x128xf32> -> vector<8x128xf32>
    %c1 = arith.constant 1 : index
    %c0_9 = arith.constant 0 : index
    %12 = vector.load %arg6[%c1, %c0_9] : memref<4x128xf32, #tpu.memory_space<vmem>>, vector<1x128xf32>
    %13 = vector.broadcast %12 : vector<1x128xf32> to vector<8x128xf32>
    %14 = arith.addf %11, %13 : vector<8x128xf32>
    %cst_10 = arith.constant 0.000000e+00 : f32
    %15 = vector.broadcast %cst_10 : f32 to vector<8x128xf32>
    %16 = arith.maximumf %14, %15 : vector<8x128xf32>
    %17 = arith.truncf %16 : vector<8x128xf32> to vector<8x128xbf16>
    %c0_11 = arith.constant 0 : index
    %c0_12 = arith.constant 0 : index
    %18 = vector.load %arg4[%c0_11, %c0_12] : memref<128x128xbf16, #tpu.memory_space<vmem>>, vector<128x128xbf16>
    %cst_13 = arith.constant dense<0.000000e+00> : vector<8x128xf32>
    %19 = tpu.matmul %17, %18, %cst_13 {dimension_numbers = #tpu.dot_dimension_numbers<[1], [0], [0], [1], [0, 0, 1, 1], [], []>} : vector<8x128xbf16>, vector<128x128xbf16>, vector<8x128xf32> -> vector<8x128xf32>
    %c2 = arith.constant 2 : index
    %c0_14 = arith.constant 0 : index
    %20 = vector.load %arg6[%c2, %c0_14] : memref<4x128xf32, #tpu.memory_space<vmem>>, vector<1x128xf32>
    %21 = vector.broadcast %20 : vector<1x128xf32> to vector<8x128xf32>
    %22 = arith.addf %19, %21 : vector<8x128xf32>
    %cst_15 = arith.constant 0.000000e+00 : f32
    %23 = vector.broadcast %cst_15 : f32 to vector<8x128xf32>
    %24 = arith.maximumf %22, %23 : vector<8x128xf32>
    %25 = arith.truncf %24 : vector<8x128xf32> to vector<8x128xbf16>
    %c0_16 = arith.constant 0 : index
    %c0_17 = arith.constant 0 : index
    %26 = vector.load %arg5[%c0_16, %c0_17] : memref<128x128xbf16, #tpu.memory_space<vmem>>, vector<128x128xbf16>
    %cst_18 = arith.constant dense<0.000000e+00> : vector<8x128xf32>
    %27 = tpu.matmul %25, %26, %cst_18 {dimension_numbers = #tpu.dot_dimension_numbers<[1], [0], [0], [1], [0, 0, 1, 1], [], []>} : vector<8x128xbf16>, vector<128x128xbf16>, vector<8x128xf32> -> vector<8x128xf32>
    %c3 = arith.constant 3 : index
    %c0_19 = arith.constant 0 : index
    %28 = vector.load %arg6[%c3, %c0_19] : memref<4x128xf32, #tpu.memory_space<vmem>>, vector<1x128xf32>
    %29 = vector.broadcast %28 : vector<1x128xf32> to vector<8x128xf32>
    %30 = arith.addf %27, %29 : vector<8x128xf32>
    %31 = arith.truncf %30 : vector<8x128xf32> to vector<8x128xbf16>
    %c0_20 = arith.constant 0 : index
    %c0_21 = arith.constant 0 : index
    %32 = vector.load %arg7[%c0_20, %c0_21] : memref<8x128xbf16, #tpu.memory_space<vmem>>, vector<8x128xbf16>
    tpu.vector_store %arg7[%c0_20, %c0_21], %31 {strides = array<i32>} : memref<8x128xbf16, #tpu.memory_space<vmem>>, vector<8x128xbf16>,
    return
  }
  func.func @transform_0(%arg0: i32) -> (i32, i32) {
    %c0_i32 = arith.constant 0 : i32
    %c0_i32_0 = arith.constant 0 : i32
    return %arg0, %c0_i32 : i32, i32
  }
  func.func @transform_1(%arg0: i32) -> (i32, i32) {
    %c0_i32 = arith.constant 0 : i32
    %c0_i32_0 = arith.constant 0 : i32
    %c0_i32_1 = arith.constant 0 : i32
    return %c0_i32, %c0_i32_0 : i32, i32
  }
  func.func @transform_2(%arg0: i32) -> (i32, i32) {
    %c0_i32 = arith.constant 0 : i32
    %c0_i32_0 = arith.constant 0 : i32
    %c0_i32_1 = arith.constant 0 : i32
    return %c0_i32, %c0_i32_0 : i32, i32
  }
  func.func @transform_3(%arg0: i32) -> (i32, i32) {
    %c0_i32 = arith.constant 0 : i32
    %c0_i32_0 = arith.constant 0 : i32
    %c0_i32_1 = arith.constant 0 : i32
    return %c0_i32, %c0_i32_0 : i32, i32
  }
  func.func @transform_4(%arg0: i32) -> (i32, i32) {
    %c0_i32 = arith.constant 0 : i32
    %c0_i32_0 = arith.constant 0 : i32
    %c0_i32_1 = arith.constant 0 : i32
    return %c0_i32, %c0_i32_0 : i32, i32
  }
  func.func @transform_5(%arg0: i32) -> (i32, i32) {
    %c0_i32 = arith.constant 0 : i32
    %c0_i32_0 = arith.constant 0 : i32
    %c0_i32_1 = arith.constant 0 : i32
    return %c0_i32, %c0_i32_0 : i32, i32
  }
  func.func @transform_6(%arg0: i32) -> (i32, i32) {
    %c0_i32 = arith.constant 0 : i32
    %c0_i32_0 = arith.constant 0 : i32
    return %arg0, %c0_i32 : i32, i32
  }
}

</mosaic_0001>

<bundles_post_ra>
// kernel: tpu_custom_call.1
= control target key start
LH: loop header
LB: loop body
LE: loop exit
PB: predicated region body
PF: predicated region fallthrough
CT: control target
= control target key end

     0   :  { %11 = vsyncpa [#allocation3], 0  ;;  %s2972_s0 = inlined_call_operand.hbm [shape: f32[8,2352], index: 0, kind: input, shape index: {}]   ;;  %s2973_s1 = inlined_call_operand.hbm [shape: bf16[2352,128], index: 1, kind: input, shape index: {}]   ;;  %s2974_s2 = inlined_call_operand.hbm [shape: bf16[128,128], index: 2, kind: input, shape index: {}]   ;;  %s2975_s3 = inlined_call_operand.hbm [shape: bf16[128,128], index: 3, kind: input, shape index: {}]   ;;  %s2976_s4 = inlined_call_operand.hbm [shape: bf16[128,128], index: 4, kind: input, shape index: {}]   ;;  %s2977_s5 = inlined_call_operand.vmem [shape: f32[4,128], index: 5, kind: input, shape index: {}]   ;;  %s2978_s6 = inlined_call_operand.hbm [shape: bf16[8,128], index: 6, kind: output, shape index: {}]  }
   0x1   :  { %12 = vsyncpa [#allocation6], 0 }
   0x2   :  { %13 = vsyncpa [#allocation9], 0 }
   0x3   :  { %14 = vsyncpa [#allocation4], 0  ;;  %s2850_s21 = smov [#allocation5]  }
   0x4   :  { %s30_s22 = sshll.u32 %s2850_s21, 4  ;;  %s31_s22 = int_to_ptr.vmem [resolvable:$true] %s30_s22 }
   0x5   :  { %s2730_s23 = scalar_lea.vmem %s31_s22, 18816  ;;  %p2735_p1 = scmp.lt.s32.totalorder %s31_s22, %s31_s22 }
   0x6   :  { %p2731_p0 = scmp.ne.s32.totalorder %s31_s22, %s2730_s23  ;;  %p2736_p2 = scmp.lt.s32.totalorder %s2730_s23, %s2730_s23 }
   0x8   :  { %p2737_p3 = por %p2736_p2, %p2735_p1 }
   0xa   :  { %p2738_p4 = pnand %p2737_p3, %p2731_p0 }
   0xc   :  { %2741 = shalt.err (!%p2738_p4)
}
   0xd   :  { %s2851_s24 = smov 64   ;;  %s2852_s25 = smov 4  }
   0xe   :  { %36 = dma.hbm_to_vmem [thread:$0]  %s2973_s1, 18816, %s31_s22, [#allocation6], %s2851_s24, %s2851_s24, %s2852_s25  }
   0xf   :  { %s2853_s28 = smov [#allocation8]   ;;  %s2854_s30 = smov [#allocation2]  }
  0x10   :  { %s54_s29 = sshll.u32 %s2853_s28, 4  ;;  %s21_s7 = sshll.u32 %s2854_s30, 4  ;;  %s55_s29 = int_to_ptr.vmem [resolvable:$true] %s54_s29  ;;  %s22_s7 = int_to_ptr.vmem [resolvable:$true] %s21_s7 }
  0x11   :  { %s2750_s8 = scalar_lea.vmem %s55_s29, 1024  ;;  %p2755_p6 = scmp.lt.s32.totalorder %s55_s29, %s55_s29 }
  0x12   :  { %p2751_p5 = scmp.ne.s32.totalorder %s55_s29, %s2750_s8  ;;  %p2756_p7 = scmp.lt.s32.totalorder %s2750_s8, %s2750_s8 }
  0x14   :  { %p2757_p8 = por %p2756_p7, %p2755_p6 }
  0x16   :  { %p2758_p9 = pnand %p2757_p8, %p2751_p5 }
  0x18   :  { %2761 = shalt.err (!%p2758_p9)
}
  0x19   :  { %60 = dma.hbm_to_vmem [thread:$0]  %s2975_s3, 1024, %s55_s29, [#allocation9], %s2851_s24, %s2851_s24, %s2852_s25  }
  0x1a   :  { %s2770_s1 = scalar_lea.vmem %s22_s7, 2432  ;;  %p2775_p11 = scmp.lt.s32.totalorder %s22_s7, %s22_s7 }
  0x1b   :  { %p2771_p10 = scmp.ne.s32.totalorder %s22_s7, %s2770_s1  ;;  %p2776_p12 = scmp.lt.s32.totalorder %s2770_s1, %s2770_s1 }
  0x1d   :  { %p2777_p13 = por %p2776_p12, %p2775_p11 }
  0x1f   :  { %p2778_p0 = pnand %p2777_p13, %p2771_p10 }
  0x21   :  { %2781 = shalt.err (!%p2778_p0)
}
  0x22   :  { %24 = dma.hbm_to_vmem [thread:$0]  %s2972_s0, 2432, %s22_s7, [#allocation3]  }
  0x23   :  { %s2855_s13 = smov [#allocation7]   ;;  %s2856_s15 = smov [#allocation10]  }
  0x24   :  { %s42_s14 = sshll.u32 %s2855_s13, 4  ;;  %s66_s16 = sshll.u32 %s2856_s15, 4  ;;  %s43_s14 = int_to_ptr.vmem [resolvable:$true] %s42_s14  ;;  %s67_s16 = int_to_ptr.vmem [resolvable:$true] %s66_s16 }
  0x25   :  { %s2790_s17 = scalar_lea.vmem %s43_s14, 1024  ;;  %p2795_p2 = scmp.lt.s32.totalorder %s43_s14, %s43_s14 }
  0x26   :  { %p2791_p1 = scmp.ne.s32.totalorder %s43_s14, %s2790_s17  ;;  %p2796_p3 = scmp.lt.s32.totalorder %s2790_s17, %s2790_s17 }
  0x28   :  { %p2797_p4 = por %p2796_p3, %p2795_p2 }
  0x2a   :  { %p2798_p5 = pnand %p2797_p4, %p2791_p1 }
  0x2c   :  { %2801 = shalt.err (!%p2798_p5)
}
  0x2d   :  { %48 = dma.hbm_to_vmem [thread:$0]  %s2974_s2, 1024, %s43_s14, [#allocation6], %s2851_s24, %s2851_s24, %s2852_s25  }
  0x2e   :  { %s2810_s0 = scalar_lea.vmem %s67_s16, 1024  ;;  %p2815_p7 = scmp.lt.s32.totalorder %s67_s16, %s67_s16 }
  0x2f   :  { %p2811_p6 = scmp.ne.s32.totalorder %s67_s16, %s2810_s0  ;;  %p2816_p8 = scmp.lt.s32.totalorder %s2810_s0, %s2810_s0 }
  0x31   :  { %p2817_p9 = por %p2816_p8, %p2815_p7 }
  0x33   :  { %p2818_p10 = pnand %p2817_p9, %p2811_p6 }
  0x35   :  { %2821 = shalt.err (!%p2818_p10)
}
  0x36   :  { %72 = dma.hbm_to_vmem [thread:$0]  %s2976_s4, 1024, %s67_s16, [#allocation9], %s2851_s24, %s2851_s24, %s2852_s25  }
  0x37   :  { %2842 = dma.done.wait [#allocation3], 2432  }
  0x38   :  { %2843 = vsyncadd [#allocation3], 4294964864 }
  0x39   :  { %2844 = dma.done.wait [#allocation6], 19840  }
  0x3a   :  { %2845 = vsyncadd [#allocation6], 4294947456 }
  0x3b   :  { %2846 = dma.done.wait [#allocation9], 2048  }
  0x3c   :  { %2847 = vsyncadd [#allocation9], 4294965248  ;;  %v2551_v0 = vld [vmem:[#allocation5 + $0x78] sm:$0xff]   ;;  %v2555_v4 = vld [vmem:[#allocation5 + $0x70] sm:$0xff]   ;;  %vm2858_vm0 = vmmov 0   ;;  %vm1310_vm1 = vcmask 392192  }
  0x3d   :  { %v2552_v1 = vld [vmem:[#allocation5 + $0x38] sm:$0xff]   ;;  %2242 = vmatprep.subr.bf16.mxu0 %v2551_v0  ;;  %v2556_v5 = vld [vmem:[#allocation5 + $0x30] sm:$0xff]   ;;  %v2559_v8 = vld [vmem:[#allocation5 + $0x68] sm:$0xff]   ;;  %s2859_s27 = smov [#allocation11]  }
  0x3e   :  { %v2553_v2 = vld [vmem:[#allocation5 + $0xf8] sm:$0xff]   ;;  %2243 = vmatpush3.bf16.msra.mxu0 %v2552_v1  ;;  %v2557_v6 = vld [vmem:[#allocation5 + $0xf0] sm:$0xff]   ;;  %v2560_v9 = vld [vmem:[#allocation5 + $0x28] sm:$0xff]   ;;  %s2055_s28 = sshll.u32 %s2859_s27, 4  ;;  %s2056_s28 = int_to_ptr.vmem [resolvable:$true] %s2055_s28 }
  0x3f   :  { %v2554_v3 = vld [vmem:[#allocation5 + $0xb8] sm:$0xff]   ;;  %2264 = vmatprep.subr.bf16.mxu1 %v2553_v2  ;;  %2244 = vmatprep.subr.bf16.mxu0 %v2555_v4  ;;  %v2558_v7 = vld [vmem:[#allocation5 + $0xb0] sm:$0xff]   ;;  %v2561_v10 = vld [vmem:[#allocation5 + $0xe8] sm:$0xff]   ;;  %s2822_s29 = scalar_lea.vmem %s2056_s28, 64  ;;  %p2827_p12 = scmp.lt.s32.totalorder %s2056_s28, %s2056_s28 }
  0x40   :  { %2265 = vmatpush3.bf16.msra.mxu1 %v2554_v3  ;;  %v2562_v11 = vld [vmem:[#allocation5 + $0xa8] sm:$0xff]   ;;  %v2563_v12 = vld [vmem:[#allocation5 + $0x60] sm:$0xff]   ;;  %v2567_v16 = vld [vmem:[#allocation5 + $0x58] sm:$0xff]   ;;  %p2823_p11 = scmp.ne.s32.totalorder %s2056_s28, %s2822_s29  ;;  %p2828_p13 = scmp.lt.s32.totalorder %s2822_s29, %s2822_s29 }
  0x41   :  { %2266 = vmatprep.subr.bf16.mxu1 %v2557_v6  ;;  %v2564_v13 = vld [vmem:[#allocation5 + $0x20] sm:$0xff]   ;;  %v2568_v17 = vld [vmem:[#allocation5 + $0x18] sm:$0xff]   ;;  %v2571_v20 = vld [vmem:[#allocation5 + $0x50] sm:$0xff]  }
  0x42   :  { %2245 = vmatpush3.bf16.msra.mxu0 %v2556_v5  ;;  %v2565_v14 = vld [vmem:[#allocation5 + $0xe0] sm:$0xff]   ;;  %v2569_v18 = vld [vmem:[#allocation5 + $0xd8] sm:$0xff]   ;;  %v2572_v21 = vld [vmem:[#allocation5 + $0x10] sm:$0xff]   ;;  %p2829_p0 = por %p2828_p13, %p2827_p12 }
  0x43   :  { %2246 = vmatprep.subr.bf16.mxu0 %v2559_v8  ;;  %v2566_v15 = vld [vmem:[#allocation5 + $0xa0] sm:$0xff]   ;;  %v2570_v19 = vld [vmem:[#allocation5 + $0x98] sm:$0xff]   ;;  %v2573_v22 = vld [vmem:[#allocation5 + $0xd0] sm:$0xff]  }
  0x44   :  { %2267 = vmatpush3.bf16.msra.mxu1 %v2558_v7  ;;  %v2574_v23 = vld [vmem:[#allocation5 + $0x90] sm:$0xff]   ;;  %v2575_v24 = vld [vmem:[#allocation5 + $0x48] sm:$0xff]   ;;  %v2579_v28 = vld [vmem:[#allocation5 + $0x40] sm:$0xff]   ;;  %p2830_p1 = pnand %p2829_p0, %p2823_p11 }
  0x45   :  { %2268 = vmatprep.subr.bf16.mxu1 %v2561_v10  ;;  %v2576_v25 = vld [vmem:[#allocation5 + $0x8] sm:$0xff]   ;;  %v2580_v29 = vld [vmem:[#allocation5] sm:$0xff]   ;;  %v92_v31 = vld [vmem:[#allocation2 + $0x8] sm:$0xff] }
  0x46   :  { %2247 = vmatpush3.bf16.msra.mxu0 %v2560_v9  ;;  %v2577_v26 = vld [vmem:[#allocation5 + $0xc8] sm:$0xff]   ;;  %v2581_v30 = vld [vmem:[#allocation5 + $0xc0] sm:$0xff]   ;;  %v111_v32 = vpack.c.bf16 %v92_v31, %v92_v31  ;;  %v2583_v36 = vld [vmem:[#allocation5 + $0x178] sm:$0xff]  }
  0x47   :  { %2248 = vmatprep.subr.bf16.mxu0 %v2563_v12  ;;  %v2578_v27 = vld [vmem:[#allocation5 + $0x88] sm:$0xff]   ;;  %v2582_v33 = vld [vmem:[#allocation5 + $0x80] sm:$0xff]   ;;  %v2584_v39 = vld [vmem:[#allocation5 + $0x138] sm:$0xff]  }
  0x48   :  { %2269 = vmatpush3.bf16.msra.mxu1 %v2562_v11  ;;  %v91_v34 = vld [vmem:[#allocation2] sm:$0xff]  ;;  %v94_v37 = vld [vmem:[#allocation2 + $0x18] sm:$0xff]  ;;  %1346 = vmatprep.mubr.bf16.mxu0 %v111_v32  ;;  %v93_v40 = vld [vmem:[#allocation2 + $0x10] sm:$0xff] }
  0x49   :  { %2270 = vmatprep.subr.bf16.mxu1 %v2565_v14  ;;  %v110_v35 = vpack.c.bf16 %v91_v34, %v91_v34  ;;  %v113_v38 = vpack.c.bf16 %v94_v37, %v94_v37  ;;  %v112_v41 = vpack.c.bf16 %v93_v40, %v93_v40  ;;  %v2585_v42 = vld [vmem:[#allocation5 + $0x1f8] sm:$0xff]   ;;  %v2587_v44 = vld [vmem:[#allocation5 + $0x170] sm:$0xff]   ;;  %v2591_v48 = vld [vmem:[#allocation5 + $0x168] sm:$0xff]  }
  0x4a   :  { %2249 = vmatpush3.bf16.msra.mxu0 %v2564_v13  ;;  %v2586_v43 = vld [vmem:[#allocation5 + $0x1b8] sm:$0xff]   ;;  %v2588_v45 = vld [vmem:[#allocation5 + $0x130] sm:$0xff]   ;;  %v2592_v49 = vld [vmem:[#allocation5 + $0x128] sm:$0xff]  }
  0x4b   :  { %2250 = vmatprep.subr.bf16.mxu0 %v2567_v16  ;;  %1386 = vmatprep.mubr.bf16.mxu1 %v113_v38  ;;  %v2589_v46 = vld [vmem:[#allocation5 + $0x1f0] sm:$0xff]   ;;  %v2593_v50 = vld [vmem:[#allocation5 + $0x1e8] sm:$0xff]   ;;  %v2595_v52 = vld [vmem:[#allocation5 + $0x160] sm:$0xff]  }
  0x4c   :  { %2271 = vmatpush3.bf16.msra.mxu1 %v2566_v15  ;;  %v2590_v47 = vld [vmem:[#allocation5 + $0x1b0] sm:$0xff]   ;;  %v2594_v51 = vld [vmem:[#allocation5 + $0x1a8] sm:$0xff]   ;;  %v2596_v53 = vld [vmem:[#allocation5 + $0x120] sm:$0xff]  }
  0x4d   :  { %2272 = vmatprep.subr.bf16.mxu1 %v2569_v18  ;;  %v2597_v54 = vld [vmem:[#allocation5 + $0x1e0] sm:$0xff]   ;;  %v2599_v56 = vld [vmem:[#allocation5 + $0x158] sm:$0xff]   ;;  %v2603_v60 = vld [vmem:[#allocation5 + $0x150] sm:$0xff]  }
  0x4e   :  { %2251 = vmatpush3.bf16.msra.mxu0 %v2568_v17  ;;  %v2598_v55 = vld [vmem:[#allocation5 + $0x1a0] sm:$0xff]   ;;  %v2600_v57 = vld [vmem:[#allocation5 + $0x118] sm:$0xff]   ;;  %v2604_v61 = vld [vmem:[#allocation5 + $0x110] sm:$0xff]  }
  0x4f   :  { %2252 = vmatprep.subr.bf16.mxu0 %v2571_v20  ;;  %v2601_v58 = vld [vmem:[#allocation5 + $0x1d8] sm:$0xff]   ;;  %v2605_v62 = vld [vmem:[#allocation5 + $0x1d0] sm:$0xff]   ;;  %v2607_v0 = vld [vmem:[#allocation5 + $0x148] sm:$0xff]  }
  0x50   :  { %2273 = vmatpush3.bf16.msra.mxu1 %v2570_v19  ;;  %v2602_v59 = vld [vmem:[#allocation5 + $0x198] sm:$0xff]   ;;  %v2606_v63 = vld [vmem:[#allocation5 + $0x190] sm:$0xff]   ;;  %v2608_v1 = vld [vmem:[#allocation5 + $0x108] sm:$0xff]  }
  0x51   :  { %2274 = vmatprep.subr.bf16.mxu1 %v2573_v22  ;;  %v2609_v2 = vld [vmem:[#allocation5 + $0x1c8] sm:$0xff]   ;;  %v2611_v4 = vld [vmem:[#allocation5 + $0x140] sm:$0xff]   ;;  %v96_v7 = vld [vmem:[#allocation2 + $0x28] sm:$0xff] }
  0x52   :  { %2253 = vmatpush3.bf16.msra.mxu0 %v2572_v21  ;;  %v2610_v3 = vld [vmem:[#allocation5 + $0x188] sm:$0xff]   ;;  %v2612_v5 = vld [vmem:[#allocation5 + $0x100] sm:$0xff]   ;;  %v115_v8 = vpack.c.bf16 %v96_v7, %v96_v7  ;;  %v2615_v12 = vld [vmem:[#allocation5 + $0x278] sm:$0xff]  }
  0x53   :  { %2254 = vmatprep.subr.bf16.mxu0 %v2575_v24  ;;  %v2613_v6 = vld [vmem:[#allocation5 + $0x1c0] sm:$0xff]   ;;  %v95_v10 = vld [vmem:[#allocation2 + $0x20] sm:$0xff]  ;;  %v2616_v15 = vld [vmem:[#allocation5 + $0x238] sm:$0xff]  }
  0x54   :  { %2275 = vmatpush3.bf16.msra.mxu1 %v2574_v23  ;;  %v2614_v9 = vld [vmem:[#allocation5 + $0x180] sm:$0xff]   ;;  %v114_v11 = vpack.c.bf16 %v95_v10, %v95_v10  ;;  %v97_v16 = vld [vmem:[#allocation2 + $0x30] sm:$0xff]  ;;  %v2619_v20 = vld [vmem:[#allocation5 + $0x270] sm:$0xff]  }
  0x55   :  { %2276 = vmatprep.subr.bf16.mxu1 %v2577_v26  ;;  %v98_v13 = vld [vmem:[#allocation2 + $0x38] sm:$0xff]  ;;  %v116_v17 = vpack.c.bf16 %v97_v16, %v97_v16  ;;  %v2617_v18 = vld [vmem:[#allocation5 + $0x2f8] sm:$0xff]   ;;  %v2620_v21 = vld [vmem:[#allocation5 + $0x230] sm:$0xff]  }
  0x56   :  { %2255 = vmatpush3.bf16.msra.mxu0 %v2576_v25  ;;  %v117_v14 = vpack.c.bf16 %v98_v13, %v98_v13  ;;  %v2618_v19 = vld [vmem:[#allocation5 + $0x2b8] sm:$0xff]   ;;  %v2621_v22 = vld [vmem:[#allocation5 + $0x2f0] sm:$0xff]   ;;  %v2623_v24 = vld [vmem:[#allocation5 + $0x268] sm:$0xff]  }
  0x57   :  { %2256 = vmatprep.subr.bf16.mxu0 %v2579_v28  ;;  %v2622_v23 = vld [vmem:[#allocation5 + $0x2b0] sm:$0xff]   ;;  %v2624_v25 = vld [vmem:[#allocation5 + $0x228] sm:$0xff]   ;;  %v2627_v28 = vld [vmem:[#allocation5 + $0x260] sm:$0xff]  }
  0x58   :  { %2277 = vmatpush3.bf16.msra.mxu1 %v2578_v27  ;;  %v2625_v26 = vld [vmem:[#allocation5 + $0x2e8] sm:$0xff]   ;;  %v2630_v31 = vld [vmem:[#allocation5 + $0x2a0] sm:$0xff]   ;;  %v2631_v32 = vld [vmem:[#allocation5 + $0x258] sm:$0xff]  }
  0x59   :  { %2278 = vmatprep.subr.bf16.mxu1 %v2581_v30  ;;  %v2626_v27 = vld [vmem:[#allocation5 + $0x2a8] sm:$0xff]   ;;  %v2629_v30 = vld [vmem:[#allocation5 + $0x2e0] sm:$0xff]   ;;  %v2633_v34 = vld [vmem:[#allocation5 + $0x2d8] sm:$0xff]  }
  0x5a   :  { %2257 = vmatpush3.bf16.msra.mxu0 %v2580_v29  ;;  %v2628_v29 = vld [vmem:[#allocation5 + $0x220] sm:$0xff]   ;;  %v2636_v37 = vld [vmem:[#allocation5 + $0x210] sm:$0xff]   ;;  %v2639_v40 = vld [vmem:[#allocation5 + $0x248] sm:$0xff]  }
  0x5b   :  { %2286 = vmatprep.subr.bf16.mxu0 %v2583_v36  ;;  %v2635_v36 = vld [vmem:[#allocation5 + $0x250] sm:$0xff]   ;;  %v2662_v7 = vld [vmem:[#allocation5 + $0x3a0] sm:$0xff]   ;;  %v2665_v10 = vld [vmem:[#allocation5 + $0x3d8] sm:$0xff]  }
  0x5c   :  { %2279 = vmatpush3.bf16.msra.mxu1 %v2582_v33  ;;  %v2632_v33 = vld [vmem:[#allocation5 + $0x218] sm:$0xff]   ;;  %v2637_v38 = vld [vmem:[#allocation5 + $0x2d0] sm:$0xff]   ;;  %v2671_v16 = vld [vmem:[#allocation5 + $0x348] sm:$0xff]  }
  0x5d   :  { %1347 = vmatmul.mubr.bf16.vlgmr.msra.gmra.mxu0 %v110_v35  ;;  %2308 = vmatprep.subr.bf16.mxu1 %v2585_v42  ;;  %v2634_v35 = vld [vmem:[#allocation5 + $0x298] sm:$0xff]   ;;  %v2641_v42 = vld [vmem:[#allocation5 + $0x2c8] sm:$0xff]   ;;  %v2668_v13 = vld [vmem:[#allocation5 + $0x310] sm:$0xff]  }
  0x5e   :  { %2287 = vmatpush3.bf16.msra.mxu0 %v2584_v39  ;;  %1426 = vmatprep.mubr.bf16.mxu0 %v115_v8  ;;  %v2638_v39 = vld [vmem:[#allocation5 + $0x290] sm:$0xff]   ;;  %v2663_v8 = vld [vmem:[#allocation5 + $0x358] sm:$0xff]  }
  0x5f   :  { %1387 = vmatmul.mubr.bf16.vlgmr.msra.gmra.mxu1 %v112_v41  ;;  %2288 = vmatprep.subr.bf16.mxu0 %v2587_v44  ;;  %v2640_v41 = vld [vmem:[#allocation5 + $0x208] sm:$0xff]   ;;  %v2643_v44 = vld [vmem:[#allocation5 + $0x240] sm:$0xff]  }
  0x60   :  { %2309 = vmatpush3.bf16.msra.mxu1 %v2586_v43  ;;  %1466 = vmatprep.mubr.bf16.mxu1 %v117_v14  ;;  %v2642_v43 = vld [vmem:[#allocation5 + $0x288] sm:$0xff]   ;;  %v2669_v14 = vld [vmem:[#allocation5 + $0x3d0] sm:$0xff]  }
  0x61   :  { %2310 = vmatprep.subr.bf16.mxu1 %v2589_v46  ;;  %v2645_v46 = vld [vmem:[#allocation5 + $0x2c0] sm:$0xff]  }
  0x62   :  { %2289 = vmatpush3.bf16.msra.mxu0 %v2588_v45  ;;  %v2644_v45 = vld [vmem:[#allocation5 + $0x200] sm:$0xff]  }
  0x63   :  { %2290 = vmatprep.subr.bf16.mxu0 %v2591_v48 }
  0x64   :  { %2311 = vmatpush3.bf16.msra.mxu1 %v2590_v47  ;;  %v100_v47 = vld [vmem:[#allocation2 + $0x48] sm:$0xff] }
  0x65   :  { %2312 = vmatprep.subr.bf16.mxu1 %v2593_v50  ;;  %v119_v48 = vpack.c.bf16 %v100_v47, %v100_v47  ;;  %v99_v50 = vld [vmem:[#allocation2 + $0x40] sm:$0xff]  ;;  %v2697_v47 = vld [vmem:[#allocation5 + $0x480] sm:$0xff]  }
  0x66   :  { %2291 = vmatpush3.bf16.msra.mxu0 %v2592_v49  ;;  %v2646_v49 = vld [vmem:[#allocation5 + $0x280] sm:$0xff]  }
  0x67   :  { %2292 = vmatprep.subr.bf16.mxu0 %v2595_v52  ;;  %v2647_v52 = vld [vmem:[#allocation5 + $0x378] sm:$0xff]  }
  0x68   :  { %2313 = vmatpush3.bf16.msra.mxu1 %v2594_v51  ;;  %v118_v51 = vpack.c.bf16 %v99_v50, %v99_v50 }
  0x69   :  { %2314 = vmatprep.subr.bf16.mxu1 %v2597_v54 }
  0x6a   :  { %2293 = vmatpush3.bf16.msra.mxu0 %v2596_v53  ;;  %v102_v53 = vld [vmem:[#allocation2 + $0x58] sm:$0xff] }
  0x6b   :  { %2294 = vmatprep.subr.bf16.mxu0 %v2599_v56  ;;  %v121_v54 = vpack.c.bf16 %v102_v53, %v102_v53  ;;  %v101_v56 = vld [vmem:[#allocation2 + $0x50] sm:$0xff]  ;;  %v2695_v53 = vld [vmem:[#allocation5 + $0x440] sm:$0xff]  }
  0x6c   :  { %2315 = vmatpush3.bf16.msra.mxu1 %v2598_v55  ;;  %v2648_v55 = vld [vmem:[#allocation5 + $0x338] sm:$0xff]  }
  0x6d   :  { %2316 = vmatprep.subr.bf16.mxu1 %v2601_v58  ;;  %v2649_v58 = vld [vmem:[#allocation5 + $0x3f8] sm:$0xff]  }
  0x6e   :  { %2295 = vmatpush3.bf16.msra.mxu0 %v2600_v57  ;;  %v120_v57 = vpack.c.bf16 %v101_v56, %v101_v56  ;;  %v107_v56 = vld [vmem:[#allocation2 + $0x80] sm:$0xff] }
  0x6f   :  { %2296 = vmatprep.subr.bf16.mxu0 %v2603_v60  ;;  %v2651_v60 = vld [vmem:[#allocation5 + $0x370] sm:$0xff]  }
  0x70   :  { %2317 = vmatpush3.bf16.msra.mxu1 %v2602_v59  ;;  %v2650_v59 = vld [vmem:[#allocation5 + $0x3b8] sm:$0xff]  }
  0x71   :  { %2318 = vmatprep.subr.bf16.mxu1 %v2605_v62  ;;  %v2653_v62 = vld [vmem:[#allocation5 + $0x3f0] sm:$0xff]  }
  0x72   :  { %2297 = vmatpush3.bf16.msra.mxu0 %v2604_v61  ;;  %v2652_v61 = vld [vmem:[#allocation5 + $0x330] sm:$0xff]  }
  0x73   :  { %2298 = vmatprep.subr.bf16.mxu0 %v2607_v0  ;;  %v2655_v0 = vld [vmem:[#allocation5 + $0x368] sm:$0xff]  }
  0x74   :  { %2319 = vmatpush3.bf16.msra.mxu1 %v2606_v63  ;;  %v2654_v63 = vld [vmem:[#allocation5 + $0x3b0] sm:$0xff]  }
  0x75   :  { %2320 = vmatprep.subr.bf16.mxu1 %v2609_v2  ;;  %v2657_v2 = vld [vmem:[#allocation5 + $0x3e8] sm:$0xff]  }
  0x76   :  { %2299 = vmatpush3.bf16.msra.mxu0 %v2608_v1  ;;  %v2656_v1 = vld [vmem:[#allocation5 + $0x328] sm:$0xff]  }
  0x77   :  { %2300 = vmatprep.subr.bf16.mxu0 %v2611_v4  ;;  %v2659_v4 = vld [vmem:[#allocation5 + $0x360] sm:$0xff]  }
  0x78   :  { %2321 = vmatpush3.bf16.msra.mxu1 %v2610_v3  ;;  %v2658_v3 = vld [vmem:[#allocation5 + $0x3a8] sm:$0xff]  }
  0x79   :  { %2322 = vmatprep.subr.bf16.mxu1 %v2613_v6  ;;  %v2661_v6 = vld [vmem:[#allocation5 + $0x3e0] sm:$0xff]  }
  0x7a   :  { %2301 = vmatpush3.bf16.msra.mxu0 %v2612_v5  ;;  %v2660_v5 = vld [vmem:[#allocation5 + $0x320] sm:$0xff]  }
  0x7b   :  { %2330 = vmatprep.subr.bf16.mxu0 %v2615_v12  ;;  %v2667_v12 = vld [vmem:[#allocation5 + $0x350] sm:$0xff]  }
  0x7c   :  { %2323 = vmatpush3.bf16.msra.mxu1 %v2614_v9  ;;  %v2664_v9 = vld [vmem:[#allocation5 + $0x318] sm:$0xff]  }
  0x7d   :  { %1427 = vmatmul.mubr.bf16.vlgmr.msra.gmra.mxu0 %v114_v11  ;;  %2352 = vmatprep.subr.bf16.mxu1 %v2617_v18  ;;  %v2666_v11 = vld [vmem:[#allocation5 + $0x398] sm:$0xff]   ;;  %v2673_v18 = vld [vmem:[#allocation5 + $0x3c8] sm:$0xff]  }
  0x7e   :  { %2331 = vmatpush3.bf16.msra.mxu0 %v2616_v15  ;;  %1506 = vmatprep.mubr.bf16.mxu0 %v119_v48  ;;  %v2670_v15 = vld [vmem:[#allocation5 + $0x390] sm:$0xff]  }
  0x7f   :  { %1467 = vmatmul.mubr.bf16.vlgmr.msra.gmra.mxu1 %v116_v17  ;;  %2332 = vmatprep.subr.bf16.mxu0 %v2619_v20  ;;  %v2672_v17 = vld [vmem:[#allocation5 + $0x308] sm:$0xff]   ;;  %v2675_v20 = vld [vmem:[#allocation5 + $0x340] sm:$0xff]   ;;  %v108_v48 = vld [vmem:[#allocation2 + $0x88] sm:$0xff] }
  0x80   :  { %2353 = vmatpush3.bf16.msra.mxu1 %v2618_v19  ;;  %1546 = vmatprep.mubr.bf16.mxu1 %v121_v54  ;;  %v2674_v19 = vld [vmem:[#allocation5 + $0x388] sm:$0xff]   ;;  %v127_v50 = vpack.c.bf16 %v108_v48, %v108_v48 }
  0x81   :  { %2354 = vmatprep.subr.bf16.mxu1 %v2621_v22  ;;  %v2677_v22 = vld [vmem:[#allocation5 + $0x3c0] sm:$0xff]  }
  0x82   :  { %2333 = vmatpush3.bf16.msra.mxu0 %v2620_v21  ;;  %v2676_v21 = vld [vmem:[#allocation5 + $0x300] sm:$0xff]  }
  0x83   :  { %2334 = vmatprep.subr.bf16.mxu0 %v2623_v24 }
  0x84   :  { %2355 = vmatpush3.bf16.msra.mxu1 %v2622_v23  ;;  %v104_v23 = vld [vmem:[#allocation2 + $0x68] sm:$0xff] }
  0x85   :  { %2356 = vmatprep.subr.bf16.mxu1 %v2625_v26  ;;  %v123_v24 = vpack.c.bf16 %v104_v23, %v104_v23  ;;  %v103_v26 = vld [vmem:[#allocation2 + $0x60] sm:$0xff] }
  0x86   :  { %2335 = vmatpush3.bf16.msra.mxu0 %v2624_v25  ;;  %v2678_v25 = vld [vmem:[#allocation5 + $0x380] sm:$0xff]  }
  0x87   :  { %2336 = vmatprep.subr.bf16.mxu0 %v2627_v28  ;;  %v2679_v28 = vld [vmem:[#allocation5 + $0x478] sm:$0xff]  }
  0x88   :  { %2357 = vmatpush3.bf16.msra.mxu1 %v2626_v27  ;;  %v122_v27 = vpack.c.bf16 %v103_v26, %v103_v26 }
  0x89   :  { %2358 = vmatprep.subr.bf16.mxu1 %v2629_v30 }
  0x8a   :  { %2337 = vmatpush3.bf16.msra.mxu0 %v2628_v29  ;;  %v106_v29 = vld [vmem:[#allocation2 + $0x78] sm:$0xff] }
  0x8b   :  { %2338 = vmatprep.subr.bf16.mxu0 %v2631_v32  ;;  %v125_v30 = vpack.c.bf16 %v106_v29, %v106_v29  ;;  %v105_v32 = vld [vmem:[#allocation2 + $0x70] sm:$0xff] }
  0x8c   :  { %2359 = vmatpush3.bf16.msra.mxu1 %v2630_v31  ;;  %v2680_v31 = vld [vmem:[#allocation5 + $0x438] sm:$0xff]  }
  0x8d   :  { %2360 = vmatprep.subr.bf16.mxu1 %v2633_v34  ;;  %v2681_v34 = vld [vmem:[#allocation5 + $0x470] sm:$0xff]  }
  0x8e   :  { %2339 = vmatpush3.bf16.msra.mxu0 %v2632_v33  ;;  %v124_v33 = vpack.c.bf16 %v105_v32, %v105_v32 }
  0x8f   :  { %2340 = vmatprep.subr.bf16.mxu0 %v2635_v36  ;;  %v2857_v36 = vmov 0.0  }
  0x90   :  { %2361 = vmatpush3.bf16.msra.mxu1 %v2634_v35  ;;  %v2682_v35 = vld [vmem:[#allocation5 + $0x430] sm:$0xff]  }
  0x91   :  { %2362 = vmatprep.subr.bf16.mxu1 %v2637_v38  ;;  %v2684_v38 = vld [vmem:[#allocation5 + $0x428] sm:$0xff]  }
  0x92   :  { %2341 = vmatpush3.bf16.msra.mxu0 %v2636_v37  ;;  %v2683_v37 = vld [vmem:[#allocation5 + $0x468] sm:$0xff]  }
  0x93   :  { %2342 = vmatprep.subr.bf16.mxu0 %v2639_v40  ;;  %v2686_v40 = vld [vmem:[#allocation5 + $0x420] sm:$0xff]  }
  0x94   :  { %2363 = vmatpush3.bf16.msra.mxu1 %v2638_v39  ;;  %v2685_v39 = vld [vmem:[#allocation5 + $0x460] sm:$0xff]  }
  0x95   :  { %2364 = vmatprep.subr.bf16.mxu1 %v2641_v42  ;;  %v2691_v42 = vld [vmem:[#allocation5 + $0x490] sm:$0xff]  }
  0x96   :  { %2343 = vmatpush3.bf16.msra.mxu0 %v2640_v41  ;;  %v2687_v41 = vld [vmem:[#allocation5 + $0x458] sm:$0xff]  }
  0x97   :  { %2344 = vmatprep.subr.bf16.mxu0 %v2643_v44  ;;  %v2689_v44 = vld [vmem:[#allocation5 + $0x450] sm:$0xff]  }
  0x98   :  { %2365 = vmatpush3.bf16.msra.mxu1 %v2642_v43  ;;  %v2688_v43 = vld [vmem:[#allocation5 + $0x418] sm:$0xff]  }
  0x99   :  { %2366 = vmatprep.subr.bf16.mxu1 %v2645_v46  ;;  %v2690_v46 = vld [vmem:[#allocation5 + $0x410] sm:$0xff]  }
  0x9a   :  { %2345 = vmatpush3.bf16.msra.mxu0 %v2644_v45  ;;  %v2694_v45 = vld [vmem:[#allocation5 + $0x488] sm:$0xff]  }
  0x9b   :  { %2374 = vmatprep.subr.bf16.mxu0 %v2647_v52  ;;  %v2693_v52 = vld [vmem:[#allocation5 + $0x408] sm:$0xff]  }
  0x9c   :  { %2367 = vmatpush3.bf16.msra.mxu1 %v2646_v49  ;;  %v2692_v49 = vld [vmem:[#allocation5 + $0x448] sm:$0xff]  }
  0x9d   :  { %1507 = vmatmul.mubr.bf16.vlgmr.msra.gmra.mxu0 %v118_v51  ;;  %2396 = vmatprep.subr.bf16.mxu1 %v2649_v58  ;;  %v109_v51 = vld [vmem:[#allocation2 + $0x90] sm:$0xff]  ;;  %v2698_v58 = vld [vmem:[#allocation7 + $0x38] sm:$0xff]  }
  0x9e   :  { %2375 = vmatpush3.bf16.msra.mxu0 %v2648_v55  ;;  %1586 = vmatprep.mubr.bf16.mxu0 %v123_v24  ;;  %v128_v54 = vpack.c.bf16 %v109_v51, %v109_v51  ;;  %v2696_v55 = vld [vmem:[#allocation5 + $0x400] sm:$0xff]  }
  0x9f   :  { %1547 = vmatmul.mubr.bf16.vlgmr.msra.gmra.mxu1 %v120_v57  ;;  %2376 = vmatprep.subr.bf16.mxu0 %v2651_v60  ;;  %v126_v57 = vpack.c.bf16 %v107_v56, %v107_v56  ;;  %v2700_v60 = vld [vmem:[#allocation7 + $0x28] sm:$0xff]  }
  0xa0   :  { %2397 = vmatpush3.bf16.msra.mxu1 %v2650_v59  ;;  %1626 = vmatprep.mubr.bf16.mxu1 %v125_v30  ;;  %v2699_v59 = vld [vmem:[#allocation7 + $0x30] sm:$0xff]  }
  0xa1   :  { %2398 = vmatprep.subr.bf16.mxu1 %v2653_v62  ;;  %v2702_v62 = vld [vmem:[#allocation7 + $0x18] sm:$0xff]  }
  0xa2   :  { %2377 = vmatpush3.bf16.msra.mxu0 %v2652_v61  ;;  %v2701_v61 = vld [vmem:[#allocation7 + $0x20] sm:$0xff]  }
  0xa3   :  { %2378 = vmatprep.subr.bf16.mxu0 %v2655_v0  ;;  %v2066_v0 = vld [vmem:[%s2977_s5] ss:$0 sm:$0xff] }
  0xa4   :  { %2399 = vmatpush3.bf16.msra.mxu1 %v2654_v63 }
  0xa5   :  { %2400 = vmatprep.subr.bf16.mxu1 %v2657_v2 }
  0xa6   :  { %2379 = vmatpush3.bf16.msra.mxu0 %v2656_v1 }
  0xa7   :  { %2380 = vmatprep.subr.bf16.mxu0 %v2659_v4 }
  0xa8   :  { %2401 = vmatpush3.bf16.msra.mxu1 %v2658_v3 }
  0xa9   :  { %2402 = vmatprep.subr.bf16.mxu1 %v2661_v6 }
  0xaa   :  { %2381 = vmatpush3.bf16.msra.mxu0 %v2660_v5 }
  0xab   :  { %2382 = vmatprep.subr.bf16.mxu0 %v2663_v8 }
  0xac   :  { %2403 = vmatpush3.bf16.msra.mxu1 %v2662_v7  ;;  %v2703_v7 = vld [vmem:[#allocation7 + $0x10] sm:$0xff]  }
  0xad   :  { %2404 = vmatprep.subr.bf16.mxu1 %v2665_v10 }
  0xae   :  { %2383 = vmatpush3.bf16.msra.mxu0 %v2664_v9 }
  0xaf   :  { %2384 = vmatprep.subr.bf16.mxu0 %v2667_v12 }
  0xb0   :  { %2405 = vmatpush3.bf16.msra.mxu1 %v2666_v11 }
  0xb1   :  { %2406 = vmatprep.subr.bf16.mxu1 %v2669_v14  ;;  %v2705_v14 = vld [vmem:[#allocation7] sm:$0xff]  }
  0xb2   :  { %2385 = vmatpush3.bf16.msra.mxu0 %v2668_v13  ;;  %v2704_v13 = vld [vmem:[#allocation7 + $0x8] sm:$0xff]  }
  0xb3   :  { %2386 = vmatprep.subr.bf16.mxu0 %v2671_v16  ;;  %v2707_v16 = vld [vmem:[#allocation8 + $0x30] sm:$0xff]  }
  0xb4   :  { %2407 = vmatpush3.bf16.msra.mxu1 %v2670_v15  ;;  %v2706_v15 = vld [vmem:[#allocation8 + $0x38] sm:$0xff]  }
  0xb5   :  { %2408 = vmatprep.subr.bf16.mxu1 %v2673_v18  ;;  %v2709_v18 = vld [vmem:[#allocation8 + $0x20] sm:$0xff]  }
  0xb6   :  { %2387 = vmatpush3.bf16.msra.mxu0 %v2672_v17  ;;  %v2708_v17 = vld [vmem:[#allocation8 + $0x28] sm:$0xff]  }
  0xb7   :  { %2388 = vmatprep.subr.bf16.mxu0 %v2675_v20 }
  0xb8   :  { %2409 = vmatpush3.bf16.msra.mxu1 %v2674_v19  ;;  %v2710_v19 = vld [vmem:[#allocation8 + $0x18] sm:$0xff]  }
  0xb9   :  { %2410 = vmatprep.subr.bf16.mxu1 %v2677_v22  ;;  %v2711_v22 = vld [vmem:[#allocation8 + $0x10] sm:$0xff]  }
  0xba   :  { %2389 = vmatpush3.bf16.msra.mxu0 %v2676_v21 }
  0xbb   :  { %2418 = vmatprep.subr.bf16.mxu0 %v2679_v28 }
  0xbc   :  { %2411 = vmatpush3.bf16.msra.mxu1 %v2678_v25 }
  0xbd   :  { %1587 = vmatmul.mubr.bf16.vlgmr.msra.gmra.mxu0 %v122_v27  ;;  %2471 = vmatprep.subr.bf16.mxu1 %v2857_v36 }
  0xbe   :  { %2419 = vmatpush3.bf16.msra.mxu0 %v2680_v31  ;;  %1666 = vmatprep.mubr.bf16.mxu0 %v127_v50 }
  0xbf   :  { %1627 = vmatmul.mubr.bf16.vlgmr.msra.gmra.mxu1 %v124_v33  ;;  %2420 = vmatprep.subr.bf16.mxu0 %v2681_v34 }
  0xc0   :  { %2477 = vmatprep.mubr.msk.bf16.mxu1 %vm2858_vm0, %v2857_v36  ;;  %2472 = vmatpush3.bf16.msra.mxu1 %v2691_v42 }
  0xc1   :  { %2473 = vmatprep.subr.bf16.mxu1 %v2857_v36 }
  0xc2   :  { %2421 = vmatpush3.bf16.msra.mxu0 %v2682_v35 }
  0xc3   :  { %2422 = vmatprep.subr.bf16.mxu0 %v2683_v37 }
  0xc4   :  { %2474 = vmatpush3.bf16.msra.mxu1 %v2694_v45 }
  0xc5   :  { %2475 = vmatprep.subr.bf16.mxu1 %v2857_v36 }
  0xc6   :  { %2423 = vmatpush3.bf16.msra.mxu0 %v2684_v38 }
  0xc7   :  { %2424 = vmatprep.subr.bf16.mxu0 %v2685_v39 }
  0xc8   :  { %2476 = vmatpush3.bf16.msra.mxu1 %v2697_v47 }
  0xc9   :  { %2481 = vmatprep.subr.bf16.mxu1 %v2857_v36 }
  0xca   :  { %2425 = vmatpush3.bf16.msra.mxu0 %v2686_v40 }
  0xcb   :  { %2426 = vmatprep.subr.bf16.mxu0 %v2687_v41  ;;  %2478 = vmatmul.mubr.msk.bf16.vlgmr.msra.gmra.mxu1 %vm1310_vm1, %v128_v54 }
  0xcc   :  { %2497 = vmatprep.mubr.msk.bf16.mxu1 %vm2858_vm0, %v2857_v36  ;;  %2482 = vmatpush3.bf16.msra.mxu1 %v2698_v58 }
  0xcd   :  { %2483 = vmatprep.subr.bf16.mxu1 %v2857_v36 }
  0xce   :  { %2427 = vmatpush3.bf16.msra.mxu0 %v2688_v43 }
  0xcf   :  { %2428 = vmatprep.subr.bf16.mxu0 %v2689_v44 }
  0xd0   :  { %2484 = vmatpush3.bf16.msra.mxu1 %v2699_v59 }
  0xd1   :  { %2485 = vmatprep.subr.bf16.mxu1 %v2857_v36 }
  0xd2   :  { %2429 = vmatpush3.bf16.msra.mxu0 %v2690_v46 }
  0xd3   :  { %2430 = vmatprep.subr.bf16.mxu0 %v2692_v49 }
  0xd4   :  { %2486 = vmatpush3.bf16.msra.mxu1 %v2700_v60 }
  0xd5   :  { %2487 = vmatprep.subr.bf16.mxu1 %v2857_v36 }
  0xd6   :  { %2431 = vmatpush3.bf16.msra.mxu0 %v2693_v52 }
  0xd7   :  { %2432 = vmatprep.subr.bf16.mxu0 %v2695_v53 }
  0xd8   :  { %2488 = vmatpush3.bf16.msra.mxu1 %v2701_v61 }
  0xd9   :  { %2489 = vmatprep.subr.bf16.mxu1 %v2857_v36 }
  0xda   :  { %2433 = vmatpush3.bf16.msra.mxu0 %v2696_v55 }
  0xdb   :  { %2501 = vmatprep.subr.bf16.mxu0 %v2857_v36 }
  0xdc   :  { %2490 = vmatpush3.bf16.msra.mxu1 %v2702_v62 }
  0xdd   :  { %1667 = vmatmul.mubr.bf16.vlgmr.msra.gmra.mxu0 %v126_v57  ;;  %2491 = vmatprep.subr.bf16.mxu1 %v2857_v36 }
  0xde   :  { %2517 = vmatprep.mubr.msk.bf16.mxu0 %vm2858_vm0, %v2857_v36  ;;  %2502 = vmatpush3.bf16.msra.mxu0 %v2706_v15  ;;  %v2215_v15 = vld [vmem:[%s2977_s5 + $0x1] ss:$0 sm:$0xff] }
  0xdf   :  { %2503 = vmatprep.subr.bf16.mxu0 %v2857_v36 }
  0xe0   :  { %2492 = vmatpush3.bf16.msra.mxu1 %v2703_v7  ;;  %v2712_v7 = vld [vmem:[#allocation8 + $0x8] sm:$0xff]  }
  0xe1   :  { %2493 = vmatprep.subr.bf16.mxu1 %v2857_v36 }
  0xe2   :  { %2504 = vmatpush3.bf16.msra.mxu0 %v2707_v16 }
  0xe3   :  { %2505 = vmatprep.subr.bf16.mxu0 %v2857_v36 }
  0xe4   :  { %2494 = vmatpush3.bf16.msra.mxu1 %v2704_v13  ;;  %v2718_v13 = vld [vmem:[#allocation10 + $0x18] sm:$0xff]  }
  0xe5   :  { %2495 = vmatprep.subr.bf16.mxu1 %v2857_v36 }
  0xe6   :  { %2506 = vmatpush3.bf16.msra.mxu0 %v2708_v17 }
  0xe7   :  { %2507 = vmatprep.subr.bf16.mxu0 %v2857_v36 }
  0xe8   :  { %2496 = vmatpush3.bf16.msra.mxu1 %v2705_v14  ;;  %v2719_v14 = vld [vmem:[#allocation10 + $0x10] sm:$0xff]  }
  0xe9   :  { %2521 = vmatprep.subr.bf16.mxu1 %v2857_v36 }
  0xea   :  { %2508 = vmatpush3.bf16.msra.mxu0 %v2709_v18 }
  0xeb   :  { %2509 = vmatprep.subr.bf16.mxu0 %v2857_v36 }
  0xee   :  { %2510 = vmatpush3.bf16.msra.mxu0 %v2710_v19 }
  0xef   :  { %2511 = vmatprep.subr.bf16.mxu0 %v2857_v36 }
  0xf2   :  { %2512 = vmatpush3.bf16.msra.mxu0 %v2711_v22 }
  0xf3   :  { %2513 = vmatprep.subr.bf16.mxu0 %v2857_v36 }
  0xf6   :  { %2514 = vmatpush3.bf16.msra.mxu0 %v2712_v7 }
  0xf7   :  { %2515 = vmatprep.subr.bf16.mxu0 %v2857_v36 }
 0x11d   :  { %v2258_v63 = vpop.f32.mrf.mxu0 }
 0x11f   :  { %v2259_v1 = vpop.f32.mrf.mxu0  ;;  %v2280_v3 = vpop.f32.mrf.mxu1 }
 0x120   :  { %v2260_v2 = vadd.f32 %v2259_v1, %v2258_v63 }
 0x121   :  { %v2261_v4 = vpop.f32.mrf.mxu0  ;;  %v2281_v6 = vpop.f32.mrf.mxu1 }
 0x122   :  { %v1349_v5 = vadd.f32 %v2260_v2, %v2066_v0  ;;  %v2282_v8 = vadd.f32 %v2281_v6, %v2280_v3 }
 0x123   :  { %v2262_v9 = vpop.f32.mrf.mxu0  ;;  %v2283_v10 = vpop.f32.mrf.mxu1 }
 0x124   :  { %v1389_v11 = vadd.f32 %v2282_v8, %v1349_v5  ;;  %v2713_v8 = vld [vmem:[#allocation8] sm:$0xff]   ;;  %v2714_v9 = vld [vmem:[#allocation10 + $0x38] sm:$0xff]   ;;  %v2715_v10 = vld [vmem:[#allocation10 + $0x30] sm:$0xff]  }
 0x125   :  { %v2284_v12 = vpop.f32.mrf.mxu1  ;;  %2516 = vmatpush3.bf16.msra.mxu0 %v2713_v8 }
 0x126   :  { %v2717_v12 = vld [vmem:[#allocation10 + $0x20] sm:$0xff]  }
 0x13d   :  { %v2302_v20 = vpop.f32.mrf.mxu0 }
 0x13f   :  { %v2303_v21 = vpop.f32.mrf.mxu0  ;;  %v2324_v24 = vpop.f32.mrf.mxu1 }
 0x140   :  { %v2304_v23 = vadd.f32 %v2303_v21, %v2302_v20 }
 0x141   :  { %v2305_v25 = vpop.f32.mrf.mxu0  ;;  %v2325_v27 = vpop.f32.mrf.mxu1 }
 0x142   :  { %v1429_v26 = vadd.f32 %v2304_v23, %v1389_v11  ;;  %v2326_v28 = vadd.f32 %v2325_v27, %v2324_v24  ;;  %v2716_v11 = vld [vmem:[#allocation10 + $0x28] sm:$0xff]   ;;  %v2721_v24 = vld [vmem:[#allocation10] sm:$0xff]   ;;  %v2224_v25 = vld [vmem:[%s2977_s5 + $0x2] ss:$0 sm:$0xff] }
 0x143   :  { %v2306_v29 = vpop.f32.mrf.mxu0  ;;  %v2327_v30 = vpop.f32.mrf.mxu1  ;;  %v2720_v23 = vld [vmem:[#allocation10 + $0x8] sm:$0xff]  }
 0x144   :  { %v1469_v31 = vadd.f32 %v2326_v28, %v1429_v26 }
 0x145   :  { %v2328_v32 = vpop.f32.mrf.mxu1 }
 0x15d   :  { %v2346_v33 = vpop.f32.mrf.mxu0 }
 0x15f   :  { %v2347_v34 = vpop.f32.mrf.mxu0  ;;  %v2368_v35 = vpop.f32.mrf.mxu1 }
 0x160   :  { %v2348_v50 = vadd.f32 %v2347_v34, %v2346_v33  ;;  %v2233_v33 = vld [vmem:[%s2977_s5 + $0x3] ss:$0 sm:$0xff] }
 0x161   :  { %v2349_v37 = vpop.f32.mrf.mxu0  ;;  %v2369_v38 = vpop.f32.mrf.mxu1 }
 0x162   :  { %v1509_v52 = vadd.f32 %v2348_v50, %v1469_v31  ;;  %v2370_v53 = vadd.f32 %v2369_v38, %v2368_v35 }
 0x163   :  { %v2350_v39 = vpop.f32.mrf.mxu0  ;;  %v2371_v40 = vpop.f32.mrf.mxu1 }
 0x164   :  { %v1549_v57 = vadd.f32 %v2370_v53, %v1509_v52 }
 0x165   :  { %v2372_v41 = vpop.f32.mrf.mxu1 }
 0x17d   :  { %v2390_v42 = vpop.f32.mrf.mxu0 }
 0x17f   :  { %v2391_v43 = vpop.f32.mrf.mxu0  ;;  %v2412_v44 = vpop.f32.mrf.mxu1 }
 0x180   :  { %v2392_v55 = vadd.f32 %v2391_v43, %v2390_v42 }
 0x181   :  { %v2393_v45 = vpop.f32.mrf.mxu0  ;;  %v2413_v46 = vpop.f32.mrf.mxu1 }
 0x182   :  { %v1589_v59 = vadd.f32 %v2392_v55, %v1549_v57  ;;  %v2414_v60 = vadd.f32 %v2413_v46, %v2412_v44 }
 0x183   :  { %v2394_v47 = vpop.f32.mrf.mxu0  ;;  %v2415_v48 = vpop.f32.mrf.mxu1 }
 0x184   :  { %v1629_v63 = vadd.f32 %v2414_v60, %v1589_v59 }
 0x185   :  { %v2416_v49 = vpop.f32.mrf.mxu1 }
 0x18b   :  { %v1708_v51 = vpop.f32.mrf.mxu1 }
 0x18d   :  { %v2479_v54 = vpop.f32.mrf.mxu1 }
 0x18f   :  { %v1711_v56 = vpop.f32.mrf.mxu1 }
 0x191   :  { %v2480_v58 = vpop.f32.mrf.mxu1 }
 0x19d   :  { %v2434_v61 = vpop.f32.mrf.mxu0 }
 0x19f   :  { %v2435_v62 = vpop.f32.mrf.mxu0 }
 0x1a0   :  { %v2436_v0 = vadd.f32 %v2435_v62, %v2434_v61 }
 0x1a1   :  { %v2437_v1 = vpop.f32.mrf.mxu0 }
 0x1a2   :  { %v1669_v2 = vadd.f32 %v2436_v0, %v1629_v63 }
 0x1a3   :  { %v2438_v3 = vpop.f32.mrf.mxu0 }
 0x1a4   :  { %v1709_v4 = vadd.f32 %v1708_v51, %v1669_v2 }
 0x1a6   :  { %v1714_v5 = vmax.f32 %v1709_v4, 0.0 }
 0x1a8   :  { %v1715_v6 = vpack.c.bf16 %v1714_v5, %v1714_v5 }
 0x1aa   :  { %2498 = vmatmul.mubr.bf16.vlgmr.msra.gmra.mxu1 %v1715_v6 }
 0x1ab   :  { %2537 = vmatprep.mubr.msk.bf16.mxu1 %vm2858_vm0, %v2857_v36  ;;  %2522 = vmatpush3.bf16.msra.mxu1 %v2714_v9 }
 0x1ac   :  { %2523 = vmatprep.subr.bf16.mxu1 %v2857_v36 }
 0x1af   :  { %2524 = vmatpush3.bf16.msra.mxu1 %v2715_v10 }
 0x1b0   :  { %2525 = vmatprep.subr.bf16.mxu1 %v2857_v36 }
 0x1b3   :  { %2526 = vmatpush3.bf16.msra.mxu1 %v2716_v11 }
 0x1b4   :  { %2527 = vmatprep.subr.bf16.mxu1 %v2857_v36 }
 0x1b7   :  { %2528 = vmatpush3.bf16.msra.mxu1 %v2717_v12 }
 0x1b8   :  { %2529 = vmatprep.subr.bf16.mxu1 %v2857_v36 }
 0x1bb   :  { %2530 = vmatpush3.bf16.msra.mxu1 %v2718_v13 }
 0x1bc   :  { %2531 = vmatprep.subr.bf16.mxu1 %v2857_v36 }
 0x1bf   :  { %2532 = vmatpush3.bf16.msra.mxu1 %v2719_v14 }
 0x1c0   :  { %2533 = vmatprep.subr.bf16.mxu1 %v2857_v36 }
 0x1c3   :  { %2534 = vmatpush3.bf16.msra.mxu1 %v2720_v23 }
 0x1c4   :  { %2535 = vmatprep.subr.bf16.mxu1 %v2857_v36 }
 0x1c7   :  { %2536 = vmatpush3.bf16.msra.mxu1 %v2721_v24 }
 0x26a   :  { %v1819_v16 = vpop.f32.mrf.mxu1 }
 0x26b   :  { %v1820_v17 = vadd.f32 %v2215_v15, %v1819_v16 }
 0x26c   :  { %v2499_v18 = vpop.f32.mrf.mxu1 }
 0x26d   :  { %v1825_v19 = vmax.f32 %v1820_v17, 0.0 }
 0x26e   :  { %v1822_v20 = vpop.f32.mrf.mxu1 }
 0x26f   :  { %v1826_v21 = vpack.c.bf16 %v1825_v19, %v1825_v19 }
 0x270   :  { %v2500_v22 = vpop.f32.mrf.mxu1 }
 0x271   :  { %2518 = vmatmul.mubr.bf16.vlgmr.msra.gmra.mxu0 %v1826_v21 }
 0x331   :  { %v1930_v26 = vpop.f32.mrf.mxu0 }
 0x332   :  { %v1931_v27 = vadd.f32 %v2224_v25, %v1930_v26 }
 0x333   :  { %v2519_v28 = vpop.f32.mrf.mxu0 }
 0x334   :  { %v1936_v29 = vmax.f32 %v1931_v27, 0.0 }
 0x335   :  { %v1933_v30 = vpop.f32.mrf.mxu0 }
 0x336   :  { %v1937_v31 = vpack.c.bf16 %v1936_v29, %v1936_v29 }
 0x337   :  { %v2520_v32 = vpop.f32.mrf.mxu0 }
 0x338   :  { %2538 = vmatmul.mubr.bf16.vlgmr.msra.gmra.mxu1 %v1937_v31 }
 0x3f8   :  { %v2041_v34 = vpop.f32.mrf.mxu1 }
 0x3f9   :  { %v2042_v36 = vadd.f32 %v2233_v33, %v2041_v34 }
 0x3fa   :  { %v2539_v35 = vpop.f32.mrf.mxu1 }
 0x3fb   :  { %v2047_v37 = vpack.c.bf16 %v2042_v36, %v2042_v36 }
 0x3fc   :  { %v2044_v38 = vpop.f32.mrf.mxu1 }
 0x3fd   :  { %2048 = vst [vmem:[#allocation11] sm:$0xf] %v2047_v37 }
 0x3fe   :  { %v2540_v39 = vpop.f32.mrf.mxu1 }
 0x3ff   :  { %2833 = shalt.err (!%p2830_p1)
}
 0x400   :  { %2058 = dma.vmem_to_hbm [thread:$0]  %s2056_s28, 64, %s2978_s6, [#allocation4]  }
 0x401   :  { %2848 = dma.done.wait [#allocation4], 64  }
 0x402   :  { %2849 = vsyncadd [#allocation4], 4294967232 }
 0x403   :  { %2062 = vsyncpa [#allocation3], 1 }
 0x404   :  { %2063 = vsyncpa [#allocation6], 1 }
 0x405   :  { %2064 = vsyncpa [#allocation9], 1 }
 0x406   :  { %2065 = vsyncpa [#allocation4], 1 }

</bundles_post_ra>
